<compile_context>
chip_gen: v6e
topology: v6e:2x2x1
jax: 0.10.0
libtpu: 0.0.40
codegen_flags: <defaults>
</compile_context>

<pallas_src>
import functools

import jax
import jax.numpy as jnp
import numpy as np
from jax.experimental import pallas as pl
from jax.experimental.pallas import tpu as pltpu


def _pixelcnn_kernel(x_ref, row_ref, col_ref,
                     w1_ref, b1_ref, w2_ref, b2_ref, w3_ref, b3_ref,
                     out_ref, *, H, W, k, n_htaps):
    """One batch element: x_ref is (1, 2*cin, H*W); out_ref is (1, 2*cout, H*W)."""
    S = H * W
    p = k // 2
    x = x_ref[0]                          # (2*cin, S) slab: rows [vi ; hi]
    row = row_ref[...]                    # (1, S) int32: y index of each lane
    col = col_ref[...]                    # (1, S) int32: x index of each lane

    def tap(src, dyo, dxo):
        # shifted[:, y*W + x] = src[:, (y+dyo)*W + (x+dxo)], zero when out of range.
        off = dyo * W + dxo
        r = src if off == 0 else pltpu.roll(src, (-off) % S, axis=1)
        conds = []
        if dyo < 0:
            conds.append(row >= -dyo)
        if dyo > 0:
            conds.append(row < H - dyo)
        if dxo < 0:
            conds.append(col >= -dxo)
        if dxo > 0:
            conds.append(col < W - dxo)
        if conds:
            m = conds[0]
            for c in conds[1:]:
                m = m & c
            r = jnp.where(m, r, 0.0)
        return r

    # ---- masked vertical k x k conv: one fused contraction over its taps ----
    v_stack = jnp.concatenate(
        [tap(x, dy - p, dx - p) for dy in range(p + 1) for dx in range(k)],
        axis=0)                                                    # (taps*2cin, S)
    vo8 = jnp.dot(w1_ref[...], v_stack,
                  preferred_element_type=jnp.float32) + b1_ref[...]   # rows [vo ; 0]

    # ---- down_shift(vo): row y <- row y-1, row 0 <- 0 -----------------------
    vshift8 = jnp.where(row >= 1, pltpu.roll(vo8, W, axis=1), 0.0)

    # ---- masked horizontal 1 x k conv + vtohori(down_shift(vo)), fused ------
    h_stack = jnp.concatenate(
        [tap(x, 0, dx - p) for dx in range(n_htaps)] + [vshift8, vo8],
        axis=0)
    z = jnp.dot(w2_ref[...], h_stack,
                preferred_element_type=jnp.float32) + b2_ref[...]     # rows [vo ; ho]
    z = jnp.maximum(z, 0.0)                                           # ReLU both halves

    # ---- htohori(relu(ho)) + residual(hi), fused into the final matmul ------
    f_stack = jnp.concatenate([z, x], axis=0)
    out = jnp.dot(w3_ref[...], f_stack,
                  preferred_element_type=jnp.float32) + b3_ref[...]   # rows [vo ; ho]
    out_ref[0] = out


def _pack_weights(params, *, mask_type, residual, k, cin, cout):
    """Fold the causal masks + all four convs into three small matrices."""
    p = k // 2
    n_htaps = p if mask_type == 'A' else p + 1
    ntaps_v = (p + 1) * k
    c2i, c2o = 2 * cin, 2 * cout
    f32 = jnp.float32

    # stage 1: vertical conv.  h_stack rows = [taps x (vi ; hi)] slabs.
    w1 = jnp.zeros((c2o, ntaps_v * c2i), f32)
    t = 0
    for dy in range(p + 1):                    # masked rows dy > k//2 skipped entirely
        for dx in range(k):
            w1 = w1.at[:cout, t * c2i: t * c2i + cin].set(params['wv'][:, :, dy, dx])
            t += 1
    b1 = jnp.zeros((c2o, 1), f32).at[:cout, 0].set(params['bv'])

    # stage 2: horizontal conv + vtohori(down_shift(vo)) + vo passthrough.
    #   rows of h_stack = [taps x (vi;hi)] + [vshift8] + [vo8]
    off_vs = n_htaps * c2i
    off_vo = off_vs + c2o
    w2 = jnp.zeros((c2o, off_vo + c2o), f32)
    for j in range(n_htaps):                   # masked taps dx > k//2 (and center for 'A') skipped
        w2 = w2.at[cout:, j * c2i + cin: (j + 1) * c2i].set(params['wh'][:, :, 0, j])
    w2 = w2.at[cout:, off_vs: off_vs + cout].set(params['wv2h'][:, :, 0, 0])
    w2 = w2.at[:cout, off_vo: off_vo + cout].set(jnp.eye(cout, dtype=f32))
    b2 = jnp.zeros((c2o, 1), f32).at[cout:, 0].set(params['bh'] + params['bv2h'])

    # stage 3: [relu(vo) passthrough ; htohori(relu(ho)) + residual hi]
    #   rows of f_stack = [relu(z)] + [x]
    w3 = jnp.zeros((c2o, c2o + c2i), f32)
    w3 = w3.at[:cout, :cout].set(jnp.eye(cout, dtype=f32))
    w3 = w3.at[cout:, cout:c2o].set(params['wh2h'][:, :, 0, 0])
    if residual:
        w3 = w3.at[cout:, c2o + cin:].set(jnp.eye(cout, dtype=f32))
    b3 = jnp.zeros((c2o, 1), f32).at[cout:, 0].set(params['bh2h'])
    return (w1, b1, w2, b2, w3, b3), n_htaps


def stacked_pixelcnn_forward(x, params, *, mask_type='B', residual=True, k=3):
    """x: NCHW (N, 2*cin, H, W) -> NCHW (N, 2*cout, H, W)."""
    N, C2, H, W = x.shape
    cin = C2 // 2
    cout = params['wv'].shape[0]
    S = H * W

    (w1, b1, w2, b2, w3, b3), n_htaps = _pack_weights(
        params, mask_type=mask_type, residual=residual, k=k, cin=cin, cout=cout)

    # channel-major slabs, flattened spatial on the lane axis (reshape only).
    x3 = x.reshape(N, C2, S).astype(jnp.float32)
    lane = jnp.arange(S, dtype=jnp.int32)
    row_idx = (lane // W).reshape(1, S)
    col_idx = (lane % W).reshape(1, S)

    full2d = lambda arr: pl.BlockSpec(arr.shape, lambda n: (0, 0))

    flops = 2 * N * S * (2 * cout) * (w1.shape[1] + w2.shape[1] + w3.shape[1])
    bytes_accessed = 4 * (x3.size + N * 2 * cout * S
                          + w1.size + w2.size + w3.size + 3 * 2 * cout + 2 * S)

    kernel = functools.partial(_pixelcnn_kernel, H=H, W=W, k=k, n_htaps=n_htaps)
    out3 = pl.pallas_call(
        kernel,
        out_shape=jax.ShapeDtypeStruct((N, 2 * cout, S), jnp.float32),
        grid=(N,),
        in_specs=[
            pl.BlockSpec((1, C2, S), lambda n: (n, 0, 0)),
            full2d(row_idx), full2d(col_idx),
            full2d(w1), full2d(b1),
            full2d(w2), full2d(b2),
            full2d(w3), full2d(b3),
        ],
        out_specs=pl.BlockSpec((1, 2 * cout, S), lambda n: (n, 0, 0)),
        compiler_params=pltpu.CompilerParams(dimension_semantics=("parallel",)),
        cost_estimate=pl.CostEstimate(flops=flops, transcendentals=0,
                                      bytes_accessed=bytes_accessed),
    )(x3, row_idx, col_idx, w1, b1, w2, b2, w3, b3)

    return out3.reshape(N, 2 * cout, H, W)


# ----------------------------- pure-JAX reference ----------------------------

def _build_masks(k, cin, cout, mask_type):
    vmask = jnp.ones((k, k, cin, cout), jnp.float32).at[k // 2 + 1:].set(0.0)
    hmask = jnp.ones((k, cin, cout), jnp.float32).at[k // 2 + 1:].set(0.0)
    if mask_type == 'A':
        hmask = hmask.at[k // 2].set(0.0)
    return vmask, hmask


def reference_forward(x, params, *, mask_type='B', residual=True, k=3):
    """Pure-JAX reference mirroring the PyTorch forward."""
    N, C2, H, W = x.shape
    cin = C2 // 2
    cout = params['wv'].shape[0]
    vi = jnp.transpose(x[:, :cin], (0, 2, 3, 1)).astype(jnp.float32)
    hi = jnp.transpose(x[:, cin:], (0, 2, 3, 1)).astype(jnp.float32)

    wv = jnp.transpose(params['wv'], (2, 3, 1, 0))       # (k,k,cin,cout)
    whf = jnp.transpose(params['wh'], (2, 3, 1, 0))      # (1,k,cin,cout)
    vmask, hmask = _build_masks(k, cin, cout, mask_type)
    wv = wv * vmask
    whf = whf * hmask[None]

    dn = ('NHWC', 'HWIO', 'NHWC')
    vo = jax.lax.conv_general_dilated(vi, wv, (1, 1), 'SAME',
                                      dimension_numbers=dn) + params['bv']
    ho = jax.lax.conv_general_dilated(hi, whf, (1, 1), 'SAME',
                                      dimension_numbers=dn) + params['bh']
    vshift = jnp.pad(vo[:, :-1], ((0, 0), (1, 0), (0, 0), (0, 0)))
    ho = ho + jnp.einsum('nhwi,io->nhwo', vshift,
                         params['wv2h'][:, :, 0, 0].T) + params['bv2h']
    vo = jax.nn.relu(vo)
    ho = jax.nn.relu(ho)
    ho = jnp.einsum('nhwi,io->nhwo', jax.nn.relu(ho),
                    params['wh2h'][:, :, 0, 0].T) + params['bh2h']
    if residual:
        ho = ho + hi
    out = jnp.concatenate([vo, ho], axis=-1)
    return jnp.transpose(out, (0, 3, 1, 2))


def init_params(key, cin, cout, k):
    ks = jax.random.split(key, 8)
    s = 0.1
    return dict(
        wv=jax.random.normal(ks[0], (cout, cin, k, k), jnp.float32) * s,
        bv=jax.random.normal(ks[1], (cout,), jnp.float32) * s,
        wh=jax.random.normal(ks[2], (cout, cin, 1, k), jnp.float32) * s,
        bh=jax.random.normal(ks[3], (cout,), jnp.float32) * s,
        wv2h=jax.random.normal(ks[4], (cout, cout, 1, 1), jnp.float32) * s,
        bv2h=jax.random.normal(ks[5], (cout,), jnp.float32) * s,
        wh2h=jax.random.normal(ks[6], (cout, cout, 1, 1), jnp.float32) * s,
        bh2h=jax.random.normal(ks[7], (cout,), jnp.float32) * s,
    )


if __name__ == "__main__":
    key = jax.random.PRNGKey(0)
    kp, kx = jax.random.split(key)

    cin = cout = 4            # residual=True requires out_channels == in_channels
    k = 3
    N, H, W = 2, 16, 16
    params = init_params(kp, cin, cout, k)
    x = jax.random.normal(kx, (N, 2 * cin, H, W), jnp.float32)   # NCHW input

    out = stacked_pixelcnn_forward(x, params, mask_type='B', residual=True, k=k)
    out = jax.block_until_ready(out)

    ref = reference_forward(x, params, mask_type='B', residual=True, k=k)
    np.testing.assert_allclose(np.asarray(out), np.asarray(ref),
                               rtol=1e-4, atol=2e-4)
    print("KERNEL_OK")
</pallas_src>

<mosaic_0001>
module attributes {stable_mosaic.version = 11 : i64} {
  func.func @_pixelcnn_kernel(%arg0: i32, %arg1: memref<1x8x256xf32, #tpu.memory_space<vmem>>, %arg2: memref<1x256xi32, #tpu.memory_space<vmem>>, %arg3: memref<1x256xi32, #tpu.memory_space<vmem>>, %arg4: memref<8x48xf32, #tpu.memory_space<vmem>>, %arg5: memref<8x1xf32, #tpu.memory_space<vmem>>, %arg6: memref<8x32xf32, #tpu.memory_space<vmem>>, %arg7: memref<8x1xf32, #tpu.memory_space<vmem>>, %arg8: memref<8x16xf32, #tpu.memory_space<vmem>>, %arg9: memref<8x1xf32, #tpu.memory_space<vmem>>, %arg10: memref<1x8x256xf32, #tpu.memory_space<vmem>>) attributes {dimension_semantics = [#tpu.dimension_semantics<parallel>], iteration_bounds = array<i64: 2>, scalar_prefetch = 0 : i64, scratch_operands = 0 : i64, tpu.core_type = #tpu.core_type<tc>, window_params = [{transform_indices = @transform_0, window_bounds = array<i64: 1, 8, 256>}, {pipeline_mode = #tpu.pipeline_mode<synchronous>, transform_indices = @transform_1, window_bounds = array<i64: 1, 256>}, {pipeline_mode = #tpu.pipeline_mode<synchronous>, transform_indices = @transform_2, window_bounds = array<i64: 1, 256>}, {pipeline_mode = #tpu.pipeline_mode<synchronous>, transform_indices = @transform_3, window_bounds = array<i64: 8, 48>}, {pipeline_mode = #tpu.pipeline_mode<synchronous>, transform_indices = @transform_4, window_bounds = array<i64: 8, 1>}, {pipeline_mode = #tpu.pipeline_mode<synchronous>, transform_indices = @transform_5, window_bounds = array<i64: 8, 32>}, {pipeline_mode = #tpu.pipeline_mode<synchronous>, transform_indices = @transform_6, window_bounds = array<i64: 8, 1>}, {pipeline_mode = #tpu.pipeline_mode<synchronous>, transform_indices = @transform_7, window_bounds = array<i64: 8, 16>}, {pipeline_mode = #tpu.pipeline_mode<synchronous>, transform_indices = @transform_8, window_bounds = array<i64: 8, 1>}, {transform_indices = @transform_9, window_bounds = array<i64: 1, 8, 256>}]} {
    %c0 = arith.constant 0 : index
    %c0_0 = arith.constant 0 : index
    %c0_1 = arith.constant 0 : index
    %0 = vector.load %arg1[%c0, %c0_0, %c0_1] : memref<1x8x256xf32, #tpu.memory_space<vmem>>, vector<1x8x256xf32>
    %1 = vector.shape_cast %0 : vector<1x8x256xf32> to vector<8x256xf32>
    %c0_2 = arith.constant 0 : index
    %c0_3 = arith.constant 0 : index
    %2 = vector.load %arg2[%c0_2, %c0_3] : memref<1x256xi32, #tpu.memory_space<vmem>>, vector<1x256xi32>
    %c0_4 = arith.constant 0 : index
    %c0_5 = arith.constant 0 : index
    %3 = vector.load %arg3[%c0_4, %c0_5] : memref<1x256xi32, #tpu.memory_space<vmem>>, vector<1x256xi32>
    %c17_i32 = arith.constant 17 : i32
    %4 = tpu.dynamic_rotate %1 by %c17_i32 dim 1 : vector<8x256xf32>, i32 -> vector<8x256xf32>
    %c1_i32 = arith.constant 1 : i32
    %5 = vector.broadcast %c1_i32 : i32 to vector<1x256xi32>
    %6 = arith.cmpi sge, %2, %5 : vector<1x256xi32>
    %c1_i32_6 = arith.constant 1 : i32
    %7 = vector.broadcast %c1_i32_6 : i32 to vector<1x256xi32>
    %8 = arith.cmpi sge, %3, %7 : vector<1x256xi32>
    %9 = arith.andi %6, %8 : vector<1x256xi1>
    %cst = arith.constant 0.000000e+00 : f32
    %10 = vector.shape_cast %9 : vector<1x256xi1> to vector<1x256xi1>
    %11 = vector.broadcast %10 : vector<1x256xi1> to vector<8x256xi1>
    %12 = vector.broadcast %cst : f32 to vector<8x256xf32>
    %13 = arith.select %11, %4, %12 : vector<8x256xi1>, vector<8x256xf32>
    %c16_i32 = arith.constant 16 : i32
    %14 = tpu.dynamic_rotate %1 by %c16_i32 dim 1 : vector<8x256xf32>, i32 -> vector<8x256xf32>
    %c1_i32_7 = arith.constant 1 : i32
    %15 = vector.broadcast %c1_i32_7 : i32 to vector<1x256xi32>
    %16 = arith.cmpi sge, %2, %15 : vector<1x256xi32>
    %cst_8 = arith.constant 0.000000e+00 : f32
    %17 = vector.shape_cast %16 : vector<1x256xi1> to vector<1x256xi1>
    %18 = vector.broadcast %17 : vector<1x256xi1> to vector<8x256xi1>
    %19 = vector.broadcast %cst_8 : f32 to vector<8x256xf32>
    %20 = arith.select %18, %14, %19 : vector<8x256xi1>, vector<8x256xf32>
    %c15_i32 = arith.constant 15 : i32
    %21 = tpu.dynamic_rotate %1 by %c15_i32 dim 1 : vector<8x256xf32>, i32 -> vector<8x256xf32>
    %c1_i32_9 = arith.constant 1 : i32
    %22 = vector.broadcast %c1_i32_9 : i32 to vector<1x256xi32>
    %23 = arith.cmpi sge, %2, %22 : vector<1x256xi32>
    %c15_i32_10 = arith.constant 15 : i32
    %24 = vector.broadcast %c15_i32_10 : i32 to vector<1x256xi32>
    %25 = arith.cmpi slt, %3, %24 : vector<1x256xi32>
    %26 = arith.andi %23, %25 : vector<1x256xi1>
    %cst_11 = arith.constant 0.000000e+00 : f32
    %27 = vector.shape_cast %26 : vector<1x256xi1> to vector<1x256xi1>
    %28 = vector.broadcast %27 : vector<1x256xi1> to vector<8x256xi1>
    %29 = vector.broadcast %cst_11 : f32 to vector<8x256xf32>
    %30 = arith.select %28, %21, %29 : vector<8x256xi1>, vector<8x256xf32>
    %c1_i32_12 = arith.constant 1 : i32
    %31 = tpu.dynamic_rotate %1 by %c1_i32_12 dim 1 : vector<8x256xf32>, i32 -> vector<8x256xf32>
    %c1_i32_13 = arith.constant 1 : i32
    %32 = vector.broadcast %c1_i32_13 : i32 to vector<1x256xi32>
    %33 = arith.cmpi sge, %3, %32 : vector<1x256xi32>
    %cst_14 = arith.constant 0.000000e+00 : f32
    %34 = vector.shape_cast %33 : vector<1x256xi1> to vector<1x256xi1>
    %35 = vector.broadcast %34 : vector<1x256xi1> to vector<8x256xi1>
    %36 = vector.broadcast %cst_14 : f32 to vector<8x256xf32>
    %37 = arith.select %35, %31, %36 : vector<8x256xi1>, vector<8x256xf32>
    %c255_i32 = arith.constant 255 : i32
    %38 = tpu.dynamic_rotate %1 by %c255_i32 dim 1 : vector<8x256xf32>, i32 -> vector<8x256xf32>
    %c15_i32_15 = arith.constant 15 : i32
    %39 = vector.broadcast %c15_i32_15 : i32 to vector<1x256xi32>
    %40 = arith.cmpi slt, %3, %39 : vector<1x256xi32>
    %cst_16 = arith.constant 0.000000e+00 : f32
    %41 = vector.shape_cast %40 : vector<1x256xi1> to vector<1x256xi1>
    %42 = vector.broadcast %41 : vector<1x256xi1> to vector<8x256xi1>
    %43 = vector.broadcast %cst_16 : f32 to vector<8x256xf32>
    %44 = arith.select %42, %38, %43 : vector<8x256xi1>, vector<8x256xf32>
    %45 = tpu.concatenate %13, %20, %30, %37, %1, %44 in 0 : vector<8x256xf32>, vector<8x256xf32>, vector<8x256xf32>, vector<8x256xf32>, vector<8x256xf32>, vector<8x256xf32> -> vector<48x256xf32>
    %c0_17 = arith.constant 0 : index
    %c0_18 = arith.constant 0 : index
    %46 = vector.load %arg4[%c0_17, %c0_18] : memref<8x48xf32, #tpu.memory_space<vmem>>, vector<8x48xf32>
    %cst_19 = arith.constant dense<0.000000e+00> : vector<8x256xf32>
    %47 = tpu.matmul %46, %45, %cst_19 {dimension_numbers = #tpu.dot_dimension_numbers<[1], [0], [0], [1], [0, 0, 1, 1], [], []>} : vector<8x48xf32>, vector<48x256xf32>, vector<8x256xf32> -> vector<8x256xf32>
    %c0_20 = arith.constant 0 : index
    %c0_21 = arith.constant 0 : index
    %48 = vector.load %arg5[%c0_20, %c0_21] : memref<8x1xf32, #tpu.memory_space<vmem>>, vector<8x1xf32>
    %49 = vector.broadcast %48 : vector<8x1xf32> to vector<8x256xf32>
    %50 = arith.addf %47, %49 : vector<8x256xf32>
    %c1_i32_22 = arith.constant 1 : i32
    %51 = vector.broadcast %c1_i32_22 : i32 to vector<1x256xi32>
    %52 = arith.cmpi sge, %2, %51 : vector<1x256xi32>
    %c16_i32_23 = arith.constant 16 : i32
    %53 = tpu.dynamic_rotate %50 by %c16_i32_23 dim 1 : vector<8x256xf32>, i32 -> vector<8x256xf32>
    %cst_24 = arith.constant 0.000000e+00 : f32
    %54 = vector.shape_cast %52 : vector<1x256xi1> to vector<1x256xi1>
    %55 = vector.broadcast %54 : vector<1x256xi1> to vector<8x256xi1>
    %56 = vector.broadcast %cst_24 : f32 to vector<8x256xf32>
    %57 = arith.select %55, %53, %56 : vector<8x256xi1>, vector<8x256xf32>
    %c1_i32_25 = arith.constant 1 : i32
    %58 = tpu.dynamic_rotate %1 by %c1_i32_25 dim 1 : vector<8x256xf32>, i32 -> vector<8x256xf32>
    %c1_i32_26 = arith.constant 1 : i32
    %59 = vector.broadcast %c1_i32_26 : i32 to vector<1x256xi32>
    %60 = arith.cmpi sge, %3, %59 : vector<1x256xi32>
    %cst_27 = arith.constant 0.000000e+00 : f32
    %61 = vector.shape_cast %60 : vector<1x256xi1> to vector<1x256xi1>
    %62 = vector.broadcast %61 : vector<1x256xi1> to vector<8x256xi1>
    %63 = vector.broadcast %cst_27 : f32 to vector<8x256xf32>
    %64 = arith.select %62, %58, %63 : vector<8x256xi1>, vector<8x256xf32>
    %65 = tpu.concatenate %64, %1, %57, %50 in 0 : vector<8x256xf32>, vector<8x256xf32>, vector<8x256xf32>, vector<8x256xf32> -> vector<32x256xf32>
    %c0_28 = arith.constant 0 : index
    %c0_29 = arith.constant 0 : index
    %66 = vector.load %arg6[%c0_28, %c0_29] : memref<8x32xf32, #tpu.memory_space<vmem>>, vector<8x32xf32>
    %cst_30 = arith.constant dense<0.000000e+00> : vector<8x256xf32>
    %67 = tpu.matmul %66, %65, %cst_30 {dimension_numbers = #tpu.dot_dimension_numbers<[1], [0], [0], [1], [0, 0, 1, 1], [], []>} : vector<8x32xf32>, vector<32x256xf32>, vector<8x256xf32> -> vector<8x256xf32>
    %c0_31 = arith.constant 0 : index
    %c0_32 = arith.constant 0 : index
    %68 = vector.load %arg7[%c0_31, %c0_32] : memref<8x1xf32, #tpu.memory_space<vmem>>, vector<8x1xf32>
    %69 = vector.broadcast %68 : vector<8x1xf32> to vector<8x256xf32>
    %70 = arith.addf %67, %69 : vector<8x256xf32>
    %cst_33 = arith.constant 0.000000e+00 : f32
    %71 = vector.broadcast %cst_33 : f32 to vector<8x256xf32>
    %72 = arith.maximumf %70, %71 : vector<8x256xf32>
    %73 = tpu.concatenate %72, %1 in 0 : vector<8x256xf32>, vector<8x256xf32> -> vector<16x256xf32>
    %c0_34 = arith.constant 0 : index
    %c0_35 = arith.constant 0 : index
    %74 = vector.load %arg8[%c0_34, %c0_35] : memref<8x16xf32, #tpu.memory_space<vmem>>, vector<8x16xf32>
    %cst_36 = arith.constant dense<0.000000e+00> : vector<8x256xf32>
    %75 = tpu.matmul %74, %73, %cst_36 {dimension_numbers = #tpu.dot_dimension_numbers<[1], [0], [0], [1], [0, 0, 1, 1], [], []>} : vector<8x16xf32>, vector<16x256xf32>, vector<8x256xf32> -> vector<8x256xf32>
    %c0_37 = arith.constant 0 : index
    %c0_38 = arith.constant 0 : index
    %76 = vector.load %arg9[%c0_37, %c0_38] : memref<8x1xf32, #tpu.memory_space<vmem>>, vector<8x1xf32>
    %77 = vector.broadcast %76 : vector<8x1xf32> to vector<8x256xf32>
    %78 = arith.addf %75, %77 : vector<8x256xf32>
    %c0_39 = arith.constant 0 : index
    %c0_40 = arith.constant 0 : index
    %c0_41 = arith.constant 0 : index
    %79 = vector.load %arg10[%c0_39, %c0_40, %c0_41] : memref<1x8x256xf32, #tpu.memory_space<vmem>>, vector<1x8x256xf32>
    %80 = vector.shape_cast %79 : vector<1x8x256xf32> to vector<8x256xf32>
    %81 = vector.shape_cast %78 : vector<8x256xf32> to vector<1x8x256xf32>
    tpu.vector_store %arg10[%c0_39, %c0_40, %c0_41], %81 {strides = array<i32>} : memref<1x8x256xf32, #tpu.memory_space<vmem>>, vector<1x8x256xf32>,
    return
  }
  func.func @transform_0(%arg0: i32) -> (i32, i32, i32) {
    %c0_i32 = arith.constant 0 : i32
    %c0_i32_0 = arith.constant 0 : i32
    %c0_i32_1 = arith.constant 0 : i32
    return %arg0, %c0_i32, %c0_i32_0 : i32, i32, i32
  }
  func.func @transform_1(%arg0: i32) -> (i32, i32) {
    %c0_i32 = arith.constant 0 : i32
    %c0_i32_0 = arith.constant 0 : i32
    %c0_i32_1 = arith.constant 0 : i32
    return %c0_i32, %c0_i32_0 : i32, i32
  }
  func.func @transform_2(%arg0: i32) -> (i32, i32) {
    %c0_i32 = arith.constant 0 : i32
    %c0_i32_0 = arith.constant 0 : i32
    %c0_i32_1 = arith.constant 0 : i32
    return %c0_i32, %c0_i32_0 : i32, i32
  }
  func.func @transform_3(%arg0: i32) -> (i32, i32) {
    %c0_i32 = arith.constant 0 : i32
    %c0_i32_0 = arith.constant 0 : i32
    %c0_i32_1 = arith.constant 0 : i32
    return %c0_i32, %c0_i32_0 : i32, i32
  }
  func.func @transform_4(%arg0: i32) -> (i32, i32) {
    %c0_i32 = arith.constant 0 : i32
    %c0_i32_0 = arith.constant 0 : i32
    %c0_i32_1 = arith.constant 0 : i32
    return %c0_i32, %c0_i32_0 : i32, i32
  }
  func.func @transform_5(%arg0: i32) -> (i32, i32) {
    %c0_i32 = arith.constant 0 : i32
    %c0_i32_0 = arith.constant 0 : i32
    %c0_i32_1 = arith.constant 0 : i32
    return %c0_i32, %c0_i32_0 : i32, i32
  }
  func.func @transform_6(%arg0: i32) -> (i32, i32) {
    %c0_i32 = arith.constant 0 : i32
    %c0_i32_0 = arith.constant 0 : i32
    %c0_i32_1 = arith.constant 0 : i32
    return %c0_i32, %c0_i32_0 : i32, i32
  }
  func.func @transform_7(%arg0: i32) -> (i32, i32) {
    %c0_i32 = arith.constant 0 : i32
    %c0_i32_0 = arith.constant 0 : i32
    %c0_i32_1 = arith.constant 0 : i32
    return %c0_i32, %c0_i32_0 : i32, i32
  }
  func.func @transform_8(%arg0: i32) -> (i32, i32) {
    %c0_i32 = arith.constant 0 : i32
    %c0_i32_0 = arith.constant 0 : i32
    %c0_i32_1 = arith.constant 0 : i32
    return %c0_i32, %c0_i32_0 : i32, i32
  }
  func.func @transform_9(%arg0: i32) -> (i32, i32, i32) {
    %c0_i32 = arith.constant 0 : i32
    %c0_i32_0 = arith.constant 0 : i32
    %c0_i32_1 = arith.constant 0 : i32
    return %arg0, %c0_i32, %c0_i32_0 : i32, i32, i32
  }
}

</mosaic_0001>

<bundles_post_ra>
// kernel: tpu_custom_call.1
= control target key start
LH: loop header
LB: loop body
LE: loop exit
PB: predicated region body
PF: predicated region fallthrough
CT: control target
= control target key end

     0   :  { %14 = vsyncpa [#allocation3], 0  ;;  %s1307_s0 = inlined_call_operand.hbm [shape: f32[2,8,256], index: 0, kind: input, shape index: {}]   ;;  %s1308_s1 = inlined_call_operand.vmem [shape: s32[1,256], index: 1, kind: input, shape index: {}]   ;;  %s1309_s2 = inlined_call_operand.vmem [shape: s32[1,256], index: 2, kind: input, shape index: {}]   ;;  %s1310_s3 = inlined_call_operand.vmem [shape: f32[8,48], index: 3, kind: input, shape index: {}]   ;;  %s1311_s4 = inlined_call_operand.vmem [shape: f32[8,1], index: 4, kind: input, shape index: {}]   ;;  %s1312_s5 = inlined_call_operand.vmem [shape: f32[8,32], index: 5, kind: input, shape index: {}]   ;;  %s1313_s6 = inlined_call_operand.vmem [shape: f32[8,1], index: 6, kind: input, shape index: {}]   ;;  %s1314_s7 = inlined_call_operand.vmem [shape: f32[8,16], index: 7, kind: input, shape index: {}]   ;;  %s1315_s8 = inlined_call_operand.vmem [shape: f32[8,1], index: 8, kind: input, shape index: {}]   ;;  %s1316_s9 = inlined_call_operand.hbm [shape: f32[2,8,256], index: 9, kind: output, shape index: {}]  }
   0x1   :  { %16 = vsyncpa [#allocation3 + $0x1], 0 }
   0x2   :  { %17 = vsyncpa [#allocation4], 0 }
   0x3   :  { %19 = vsyncpa [#allocation4 + $0x1], 0  ;;  %s1044_s30 = smov 0   ;;  %s1046_s10 = smov 0  }
   0x4   :  { %s1048_s11 = smov 0   ;;  %s1050_s12 = smov 0  }
   0x5 LB: > { %1320 = sst [smem:[#allocation8_spill]] %s979_s11  ;;  %s1065_s13 = sadd.s32 4294967295, %s983_s12   ;;  %s983_s12 = sphi %s1050_s12, %s1345_s12   ;;  %s979_s11 = sphi %s1048_s11, %s1342_s11   ;;  %s975_s10 = sphi %s1046_s10, %s1344_s10   ;;  %s971_s30 = sphi %s1044_s30, %s1343_s30  }
   0x6   : > { %s803_s14 = sadd.s32 4294967294, %s983_s12   ;;  %s1069_s15 = sadd.s32 1, %s983_s12  }
   0x7   : > { %s32_s16 = sadd.s32 1, %s979_s11  ;;  %s29_s17 = ssub.s32 %s983_s12, %s1069_s15 }
   0x8   : > { %p39_p0 = scmp.ne.s32.totalorder %s979_s11, %s975_s10  ;;  %p30_p1 = scmp.eq.s32.totalorder %s29_s17, 0 }
   0x9   : > { %p40_p2 = scmp.eq.s32.totalorder %s983_s12, 0  ;;  %p45_p3 = scmp.ne.s32.totalorder %s975_s10, %s971_s30 }
   0xa   : > { %p46_p4 = scmp.eq.s32.totalorder %s1065_s13, 0  ;;  %p237_p7 = scmp.eq.s32.totalorder %s1065_s13, 1 }
   0xb   : > { %s1081_s18 = scalar_select %p30_p1, %s979_s11, %s32_s16  }
   0xc   : > { %p1083_p5 = por %p40_p2, %p39_p0  ;;  %p1087_p6 = por %p46_p4, %p45_p3 }
   0xd   : > { %1321 = sst [smem:[#allocation9_spill]] %s1081_s18  ;;  %p243_p8 = scmp.eq.s32.totalorder %s803_s14, 1 }
   0xe   : > { %s1323_s20 = scalar_select %p1087_p6, 1, 0 }
   0xf   : > { %p848_p10 = scmp.lt.s32.totalorder %s983_s12, 2  ;;  %p1094_p11 = por %p237_p7, %p39_p0 }
  0x10   : > { %p1098_p12 = por %p243_p8, %p45_p3  ;;  %s287_s23 = sand.u32 1, %s979_s11  }
  0x11   : > { %s1324_s21 = scalar_select %p1094_p11, 1, 0 }
  0x12   : > { %s1325_s22 = scalar_select %p1098_p12, 1, 0 }
  0x13   : > { %s834_s24 = sshll.u32 %s983_s12, 8  ;;  %s806_s25 = sshll.u32 %s287_s23, 4 }
  0x14   : > { %s1107_s28 = scalar_lea.hbm %s1307_s0, %s834_s24  ;;  %s291_s29 = scalar_lea.vmem [#allocation2], %s806_s25 }
  0x15   : > { %s299_s14 = sshll.u32 %s291_s29, 4  ;;  %p1111_p13 = pnand %p848_p10, %p1083_p5  ;;  %s1115_s14 = int_to_ptr.vmem [resolvable:$true] %s299_s14 }
  0x16   : > { %s288_s17 = scalar_lea.sflag [#allocation3], %s287_s23  ;;  %s891_s18 = scalar_lea.hbm %s1107_s28, 256 }
  0x17   : > { %p892_p2 = scmp.ne.s32.totalorder %s1107_s28, %s891_s18  ;;  %p893_p3 = pneg %p1111_p13 }
  0x18   : > { %s896_s19 = scalar_lea.hbm %s1307_s0, 512  ;;  %p897_p5 = scmp.lt.s32.totalorder %s1107_s28, %s1307_s0 }
  0x19   : > { %p894_p4 = pnand %p893_p3, %p892_p2  ;;  %p898_p8 = scmp.lt.s32.totalorder %s896_s19, %s891_s18 }
  0x1b   : > { %p895_p7 = pneg %p894_p4  ;;  %p899_p10 = por %p898_p8, %p897_p5 }
  0x1d   : > { %p900_p9 = pnand %p899_p10, %p895_p7 }
  0x1f   : > { %903 = shalt.err (!%p900_p9)
}
  0x20   : > { %s904_s23 = scalar_lea.vmem %s1115_s14, 256  ;;  %s985_s29 = smov [#allocation2]  }
  0x21   : > { %p905_p0 = scmp.ne.s32.totalorder %s1115_s14, %s904_s23  ;;  %s909_s11 = sshll.u32 %s985_s29, 4  ;;  %s910_s11 = int_to_ptr.vmem [resolvable:$false] %s909_s11 }
  0x22   : > { %s911_s24 = scalar_lea.vmem %s910_s11, 512  ;;  %p912_p4 = scmp.lt.s32.totalorder %s1115_s14, %s910_s11 }
  0x23   : > { %p907_p1 = pnand %p905_p0, %p893_p3  ;;  %p913_p12 = scmp.lt.s32.totalorder %s911_s24, %s904_s23 }
  0x25   : > { %p908_p2 = pneg %p907_p1  ;;  %p914_p11 = por %p913_p12, %p912_p4 }
  0x27   : > { %p915_p6 = pnand %p914_p11, %p908_p2 }
  0x29   : > { %918 = shalt.err (!%p915_p6)
}
  0x2a   : > { %843 = dma.hbm_to_vmem [thread:$0]  (!%p1111_p13), %s1107_s28, 256, %s1115_s14, %s288_s17  }
  0x2b   : > { %p1327_p9 = scmp.lt.s32.totalorder %s983_s12, 3  ;;  %p1328_p7 = scmp.ge.s32.totalorder %s983_s12, 1 }
  0x2d   : > { %p305_p0 = pnand %p1328_p7, %p1327_p9 }
  0x2e   : > { %s1142_s18 = sand.u32 (!%p305_p0), 1, %s975_s10   ;;  %p1329_p6 = scmp.ne.s32.totalorder (!%p305_p0), %s1323_s20, 0 }
  0x2f   : > { %308 = sbr.rel (%p305_p0) target bundleno = 921 (0x399), region = 56  ;;  %s810_s11 = sshll.u32 (!%p305_p0), %s1142_s18, 4 }
  0x30   : > { %s311_s25 = scalar_lea.sflag (!%p305_p0), [#allocation3], %s1142_s18  ;;  %s314_s16 = scalar_lea.vmem (!%p305_p0), [#allocation2], %s810_s11 }
  0x34   : > { %962 = dma.done.wait (%p1329_p6), %s311_s25, 256  }
  0x35   : > { %964 = vsyncadd (%p1329_p6), %s311_s25, 4294967040  ;;  %v986_v0 = vmov 0   ;;  %v1154_v1 = vld [vmem:[%s314_s16] sm:$0xff]  ;;  %s987_s28 = smov 1   ;;  %s988_s14 = smov 127   ;;  %v1158_v2 = vld [vmem:[%s314_s16 + $0x8] sm:$0xff]  ;;  %v357_v6 = vlaneseq }
  0x36   : > { %889 = vset.pattern.permute.xlu0 %v986_v0  ;;  %890 = vset.pattern.permute.xlu1 %v986_v0  ;;  %v989_v3 = vmov 0.0   ;;  %s990_s20 = smov 15   ;;  %s991_s17 = smov 16   ;;  %v461_v4 = vld [vmem:[%s1311_s4] sm:$0xff] }
  0x37   : > { %420 = vrot.lane.b32.xlu1 %v1154_v1, %s987_s28  ;;  %440 = vrot.lane.b32.xlu0 %v1154_v1, %s988_s14  ;;  %s992_s19 = smov 17   ;;  %v551_v5 = vld [vmem:[%s1313_s6] sm:$0xff]  ;;  %v367_v8 = vshrl.u32 %v357_v6, 7  ;;  %v1185_v13 = vand.u32 127, %v357_v6  ;;  %s835_s24 = sshll.u32 %s1065_s13, 8 }
  0x38   : > { %535 = vmatprep.mubr.f32.mxu0 %v989_v3  ;;  %625 = vmatprep.mubr.f32.mxu1 %v989_v3  ;;  %v352_v7 = vld [vmem:[%s1309_s2] sm:$0x3]  ;;  %s348_s25 = scalar_lea.vmem [#allocation5], %s810_s11  ;;  %p1338_p12 = scmp.ne.s32.totalorder %s1324_s21, 0 }
  0x39   : > { %v351_v9 = vld [vmem:[%s1308_s1] sm:$0x3]  ;;  %vm405_vm0 = vcmp.lt.s32.totalorder %v352_v7, 15  ;;  %v372_v10 = vsub.s32 1, %v367_v8  ;;  %v368_v12 = vsub.s32 0, %v367_v8  ;;  %vm363_vm2 = vcmp.ge.s32.totalorder %v352_v7, 1 }
  0x3a   : > { %vm362_vm1 = vcmp.ge.s32.totalorder %v351_v9, 1  ;;  %v447_v11 = vsel %vm405_vm0, 1, %v986_v0  ;;  %v427_v18 = vsel %vm363_vm2, 1, %v986_v0  ;;  %vm444_vm4 = vcmp.lt.s32.totalorder %v1185_v13, 127  ;;  %v460_v52 = vld [vmem:[%s1310_s3] sm:$0xff]  ;;  %s733_s16 = sshll.u32 %s348_s25, 4  ;;  %s734_s16 = int_to_ptr.vmem [resolvable:$true] %s733_s16 }
  0x3b   : > { %422 = vrot.lane.b32.xlu1 %v1158_v2, %s987_s28  ;;  %442 = vrot.lane.b32.xlu0 %v1158_v2, %s988_s14  ;;  %vm406_vm3 = vmand %vm362_vm1, %vm405_vm0  ;;  %v455_v14 = vrot.slane %v447_v11, %v372_v10  ;;  %v451_v17 = vrot.slane %v447_v11, %v368_v12  ;;  %v435_v20 = vrot.slane %v427_v18, %v372_v10  ;;  %v385_v24 = vsel %vm362_vm1, 1, %v986_v0  ;;  %v550_v62 = vld [vmem:[%s1312_s5] sm:$0xff]  ;;  %s993_s13 = smov [#allocation5]  }
  0x3c   : > { %v407_v19 = vsel %vm406_vm3, 1, %v986_v0  ;;  %v431_v23 = vrot.slane %v427_v18, %v368_v12  ;;  %vm364_vm7 = vmand %vm362_vm1, %vm363_vm2  ;;  %vm424_vm8 = vcmp.lt.s32.totalorder %v1185_v13, 1  ;;  %v393_v30 = vrot.slane %v385_v24, %v372_v10  ;;  %v635_v63 = vld [vmem:[%s1315_s8] sm:$0xff]  ;;  %s923_s26 = sshll.u32 %s993_s13, 4  ;;  %s924_s26 = int_to_ptr.vmem [resolvable:$false] %s923_s26 }
  0x3d   : > { %vm457_vm5 = vcmp.eq.s32.totalorder %v455_v14, 1  ;;  %vm456_vm6 = vcmp.eq.s32.totalorder %v451_v17, 1  ;;  %v415_v27 = vrot.slane %v407_v19, %v372_v10  ;;  %v411_v28 = vrot.slane %v407_v19, %v368_v12  ;;  %s925_s11 = scalar_lea.vmem %s924_s26, 512  ;;  %p926_p3 = scmp.lt.s32.totalorder %s734_s16, %s924_s26 }
  0x3e   : > { %vm1197_vm9 = vcmp.eq.s32.totalorder %v435_v20, 1  ;;  %vm402_vm10 = vcmp.lt.s32.totalorder %v1185_v13, 15  ;;  %vm1203_vm11 = vcmp.eq.s32.totalorder %v431_v23, 1  ;;  %v389_v34 = vrot.slane %v385_v24, %v368_v12 }
  0x3f   : > { %400 = vrot.lane.b32.xlu1 %v1158_v2, %s990_s20  ;;  %398 = vrot.lane.b32.xlu0 %v1154_v1, %s990_s20  ;;  %v365_v35 = vsel %vm364_vm7, 1, %v986_v0  ;;  %vm417_vm12 = vcmp.eq.s32.totalorder %v415_v27, 1  ;;  %vm382_vm13 = vcmp.lt.s32.totalorder %v1185_v13, 16  ;;  %vm416_vm14 = vcmp.eq.s32.totalorder %v411_v28, 1  ;;  %s731_s20 = scalar_lea.hbm %s1316_s9, %s835_s24 }
  0x40   : > { %vm1220_vm15 = vcmp.eq.s32.totalorder %v393_v30, 1  ;;  %v373_v40 = vrot.slane %v365_v35, %v372_v10  ;;  %vm1226_vm0 = vcmp.eq.s32.totalorder %v389_v34, 1  ;;  %v369_v45 = vrot.slane %v365_v35, %v368_v12 }
  0x41   : > { %vm359_vm1 = vcmp.lt.s32.totalorder %v1185_v13, 17 }
  0x42   : > { %vm375_vm2 = vcmp.eq.s32.totalorder %v373_v40, 1  ;;  %vm374_vm3 = vcmp.eq.s32.totalorder %v369_v45, 1 }
  0x43   : > { %380 = vrot.lane.b32.xlu1 %v1158_v2, %s991_s17  ;;  %378 = vrot.lane.b32.xlu0 %v1154_v1, %s991_s17 }
  0x47   : > { %355 = vrot.lane.b32.xlu1 %v1158_v2, %s992_s19  ;;  %353 = vrot.lane.b32.xlu0 %v1154_v1, %s992_s19  ;;  %s719_s19 = scalar_lea.sflag [#allocation4], %s1142_s18 }
  0x4b   : > { %464 = vperm.xlu0 %889, %v461_v4  }
  0x4f   : > { %554 = vperm.xlu0 %889, %v551_v5  }
  0xa9   : > { %v421_v15 = vpop.permute.xlu1 %420  ;;  %v441_v16 = vpop.permute.xlu0 %440 }
  0xad   : > { %v423_v21 = vpop.permute.xlu1 %422  ;;  %v443_v22 = vpop.permute.xlu0 %442 }
  0xae   : > { %v446_v25 = vsel %vm444_vm4, %v443_v22, %v441_v16  ;;  %v445_v26 = vsel %vm444_vm4, %v441_v16, %v443_v22  ;;  %v425_v36 = vsel %vm424_vm8, %v421_v15, %v423_v21  ;;  %v426_v37 = vsel %vm424_vm8, %v423_v21, %v421_v15 }
  0xaf   : > { %812 = vmatprep.subr.msk.mxu0 %vm457_vm5, %v446_v25  ;;  %vm467_vm4 = vcmask 392192   ;;  %vm557_vm5 = vcmask 261120  }
  0xb0   : > { %813 = vmatpush1.msk.msra.mxu0 %vm456_vm6, %v445_v26  ;;  %vm641_vm6 = vcmask 130048  }
  0xb1   : > { %v401_v31 = vpop.permute.xlu1 %400  ;;  %493 = vmatprep.subr.mxu0 %v1158_v2  ;;  %v399_v32 = vpop.permute.xlu0 %398 }
  0xb2   : > { %494 = vmatpush1.msra.mxu0 %v1154_v1  ;;  %v403_v38 = vsel %vm402_vm10, %v399_v32, %v401_v31  ;;  %v404_v41 = vsel %vm402_vm10, %v401_v31, %v399_v32 }
  0xb3   : > { %814 = vmatprep.subr.msk.mxu0 %vm1197_vm9, %v425_v36 }
  0xb4   : > { %815 = vmatpush1.msk.msra.mxu0 %vm1203_vm11, %v426_v37 }
  0xb5   : > { %v381_v42 = vpop.permute.xlu1 %380  ;;  %816 = vmatprep.subr.msk.mxu0 %vm417_vm12, %v403_v38  ;;  %v379_v43 = vpop.permute.xlu0 %378 }
  0xb6   : > { %v383_v46 = vsel %vm382_vm13, %v379_v43, %v381_v42  ;;  %v384_v47 = vsel %vm382_vm13, %v381_v42, %v379_v43  ;;  %817 = vmatpush1.msk.msra.mxu0 %vm416_vm14, %v404_v41 }
  0xb7   : > { %818 = vmatprep.subr.msk.mxu0 %vm1220_vm15, %v383_v46 }
  0xb8   : > { %819 = vmatpush1.msk.msra.mxu0 %vm1226_vm0, %v384_v47 }
  0xb9   : > { %v356_v48 = vpop.permute.xlu1 %355  ;;  %v354_v49 = vpop.permute.xlu0 %353 }
  0xba   : > { %v360_v50 = vsel %vm359_vm1, %v354_v49, %v356_v48  ;;  %v361_v51 = vsel %vm359_vm1, %v356_v48, %v354_v49 }
  0xbb   : > { %820 = vmatprep.subr.msk.mxu0 %vm375_vm2, %v360_v50 }
  0xbc   : > { %821 = vmatpush1.msk.msra.mxu0 %vm374_vm3, %v361_v51 }
  0xbd   : > { %822 = vmatmul.mubr.msk.f32.vlgmr.msra.gmra.mxu0 %vm467_vm4, %v460_v52 }
  0xc6   : > { %v465_v53 = vpop.permute.xlu0 %464 }
  0xca   : > { %v555_v4 = vpop.permute.xlu0 %554 }
 0x17d   : > { %v537_v54 = vpop.f32.mrf.mxu0 }
 0x17e   : > { %v538_v55 = vadd.f32 %v537_v54, %v465_v53 }
 0x17f   : > { %v539_v56 = vpop.f32.mrf.mxu0 }
 0x180   : > { %v540_v57 = vadd.f32 %v539_v56, %v465_v53  ;;  %542 = vrot.lane.b32.xlu1 %v538_v55, %s991_s17 }
 0x182   : > { %585 = vmatprep.subr.mxu1 %v540_v57 }
 0x183   : > { %586 = vmatpush1.msra.mxu1 %v538_v55 }
 0x184   : > { %544 = vrot.lane.b32.xlu1 %v540_v57, %s991_s17  ;;  %s919_s17 = scalar_lea.vmem %s734_s16, 256 }
 0x185   : > { %p920_p11 = scmp.ne.s32.totalorder %s734_s16, %s919_s17  ;;  %p927_p5 = scmp.lt.s32.totalorder %s925_s11, %s919_s17 }
 0x187   : > { %p921_p13 = pnand %p920_p11, %p1338_p12  ;;  %p928_p8 = por %p927_p5, %p926_p3 }
 0x188   : > { %638 = vperm.xlu1 %890, %v635_v63  }
 0x189   : > { %p922_p1 = pneg %p921_p13 }
 0x18b   : > { %p929_p10 = pnand %p928_p8, %p922_p1 }
 0x1f2   : > { %v543_v58 = vpop.permute.xlu1 %542 }
 0x1f6   : > { %v545_v59 = vpop.permute.xlu1 %544 }
 0x1f7   : > { %v546_v60 = vsel %vm382_vm13, %v543_v58, %v545_v59  ;;  %v547_v61 = vsel %vm382_vm13, %v545_v59, %v543_v58 }
 0x1f8   : > { %823 = vmatprep.subr.msk.mxu1 %vm1220_vm15, %v546_v60 }
 0x1f9   : > { %824 = vmatpush1.msk.msra.mxu1 %vm1226_vm0, %v547_v61 }
 0x1fa   : > { %589 = vmatprep.subr.mxu1 %v1158_v2 }
 0x1fb   : > { %590 = vmatpush1.msra.mxu1 %v1154_v1 }
 0x1fc   : > { %825 = vmatprep.subr.msk.mxu1 %vm1197_vm9, %v425_v36 }
 0x1fd   : > { %826 = vmatpush1.msk.msra.mxu1 %vm1203_vm11, %v426_v37 }
 0x1fe   : > { %827 = vmatmul.mubr.msk.f32.vlgmr.msra.gmra.mxu1 %vm557_vm5, %v550_v62  ;;  %673 = vmatprep.subr.mxu1 %v1158_v2 }
 0x1ff   : > { %674 = vmatpush1.msra.mxu1 %v1154_v1  ;;  %709 = vmatprep.mubr.f32.mxu1 %v989_v3  ;;  %v634_v1 = vld [vmem:[%s1314_s7] sm:$0xff] }
 0x203   : > { %v639_v2 = vpop.permute.xlu1 %638 }
 0x2be   : > { %v627_v0 = vpop.f32.mrf.mxu1 }
 0x2bf   : > { %v628_v5 = vadd.f32 %v627_v0, %v555_v4 }
 0x2c0   : > { %v629_v6 = vpop.f32.mrf.mxu1 }
 0x2c1   : > { %v630_v7 = vadd.f32 %v629_v6, %v555_v4  ;;  %v632_v9 = vmax.f32 %v628_v5, 0.0 }
 0x2c3   : > { %v633_v8 = vmax.f32 %v630_v7, 0.0 }
 0x2c5   : > { %675 = vmatprep.subr.mxu1 %v633_v8 }
 0x2c6   : > { %676 = vmatpush1.msra.mxu1 %v632_v9 }
 0x2c7   : > { %828 = vmatmul.mubr.msk.f32.vlgmr.msra.gmra.mxu1 %vm641_vm6, %v634_v1 }
 0x387   : > { %v711_v3 = vpop.f32.mrf.mxu1 }
 0x388   : > { %v712_v10 = vadd.f32 %v711_v3, %v639_v2 }
 0x389   : > { %v713_v11 = vpop.f32.mrf.mxu1 }
 0x38a   : > { %716 = vst [vmem:[%s348_s25] sm:$0xff] %v712_v10  ;;  %v714_v12 = vadd.f32 %v713_v11, %v639_v2 }
 0x38c   : > { %717 = vst [vmem:[%s348_s25 + $0x8] sm:$0xff] %v714_v12 }
 0x38d   : > { %932 = shalt.err (!%p929_p10)
}
 0x38e   : > { %s933_s27 = scalar_lea.hbm %s731_s20, 256  ;;  %s937_s29 = scalar_lea.hbm %s1316_s9, 512 }
 0x38f   : > { %p934_p2 = scmp.ne.s32.totalorder %s731_s20, %s933_s27  ;;  %p938_p7 = scmp.lt.s32.totalorder %s731_s20, %s1316_s9 }
 0x390   : > { %p939_p0 = scmp.lt.s32.totalorder %s937_s29, %s933_s27 }
 0x391   : > { %p935_p4 = pnand %p934_p2, %p1338_p12 }
 0x392   : > { %p940_p6 = por %p939_p0, %p938_p7 }
 0x393   : > { %p936_p9 = pneg %p935_p4 }
 0x395   : > { %p941_p11 = pnand %p940_p6, %p936_p9 }
 0x397   : > { %944 = shalt.err (!%p941_p11)
}
 0x398   : > { %838 = dma.vmem_to_hbm [thread:$0]  (%p1338_p12), %s734_s16, 256, %s731_s20, %s719_s19  }
 0x399 PF: > { %s745_s28 = sand.u32 1, %s971_s30   ;;  %p1339_p13 = scmp.ne.s32.totalorder %s1325_s22, 0 }
 0x39a   : > { %p1340_p1 = scmp.ge.s32.totalorder %s983_s12, 2  ;;  %s746_s14 = scalar_lea.sflag [#allocation4], %s745_s28 }
 0x39c   : > { %p845_p3 = pnand %p1340_p1, %p1339_p13 }
 0x39e   : > { %p846_p5 = pneg %p845_p3 }
 0x3a0   : > { %966 = dma.done.wait (%p846_p5), %s746_s14, 256  }
 0x3a1   : > { %968 = vsyncadd (%p846_p5), %s746_s14, 4294967040  ;;  %s1341_s17 = sld [smem:[#allocation8_spill]]  ;;  %p22_p8 = scmp.ge.s32.totalorder %s1069_s15, 4  }
 0x3a2   : > { %s1342_s11 = sld [smem:[#allocation9_spill]]  ;;  %s1343_s30 = smov %s975_s10 }
 0x3a3   : > { %s1345_s12 = smov %s1069_s15  ;;  %24 = sbr.rel (!%p22_p8) target bundleno = 5 (0x5), region = 101 }
 0x3a7   : > { %s1344_s10 = smov %s1341_s17 }
 0x3a8   :  { %751 = vsyncpa [#allocation3], 1 }
 0x3a9   :  { %753 = vsyncpa [#allocation3 + $0x1], 1 }
 0x3aa   :  { %754 = vsyncpa [#allocation4], 1 }
 0x3ab   :  { %756 = vsyncpa [#allocation4 + $0x1], 1 }

</bundles_post_ra>
